<compile_context>
chip_gen: v7x
topology: tpu7x:2x2x1
jax: 0.10.0
libtpu: 0.0.40
codegen_flags: <defaults>
</compile_context>

<pallas_src>
import functools

import jax
import jax.numpy as jnp
from jax.experimental import pallas as pl
from jax.experimental.pallas import tpu as pltpu


# -----------------------------------------------------------------------------
# Kernel
# -----------------------------------------------------------------------------
def _position_loss_kernel(ii_ref, jj_ref, rows_ref, cols_ref, out_ref, acc_ref,
                          *, threshold, scale):
    """One (row-block, col-block) tile of the symmetric hinge-loss matrix.

    ii_ref, jj_ref: (num_pairs,) int32 SMEM -- block-pair schedule (prefetch)
    rows_ref: (T, D)  f32 VMEM -- this row block's points (points on sublanes)
    cols_ref: (D, T)  f32 VMEM -- this col block's points, transposed (lanes)
    out_ref : (1, 1)  f32 SMEM -- scalar loss output
    acc_ref : (T, T)  f32 VMEM -- running element-wise sum across grid steps
    """
    p = pl.program_id(0)

    @pl.when(p == 0)
    def _init():
        acc_ref[...] = jnp.zeros_like(acc_ref)

    rows = rows_ref[...]                       # (T, D)
    cols = cols_ref[...]                       # (D, T)
    tile_r = rows.shape[0]
    tile_c = cols.shape[1]
    d = rows.shape[1]

    # Pairwise squared distances, accumulated coordinate-by-coordinate so every
    # intermediate is a lane-dense (T, T) tensor.  D is tiny & static, so this
    # Python loop fully unrolls into a handful of VPU ops; differences are
    # exact, so self / sentinel pairs give dist2 == 0 exactly.
    dist2 = jnp.zeros((tile_r, tile_c), jnp.float32)
    for k in range(d):
        diff = rows[:, k:k + 1] - cols[k:k + 1, :]        # (T, T)
        dist2 = dist2 + diff * diff
    dist = jnp.sqrt(dist2)                                # EUP

    # hinge = (threshold - dist) on pairs with 0 < dist <= threshold
    hinge = jnp.where(dist2 != 0.0,
                      jnp.maximum(threshold - dist, 0.0),
                      0.0)

    # Off-diagonal block pairs represent both (i, j) and (j, i) halves of the
    # symmetric matrix -> weight 2; diagonal blocks are counted once.
    i_blk = ii_ref[p]
    j_blk = jj_ref[p]
    weight = jnp.where(i_blk == j_blk, 1.0, 2.0).astype(jnp.float32)
    acc_ref[...] += weight * hinge             # pure VPU adds, no per-step XLU

    @pl.when(p == pl.num_programs(0) - 1)
    def _finalize():
        out_ref[0, 0] = scale * jnp.sum(acc_ref[...])


# -----------------------------------------------------------------------------
# Wrapper
# -----------------------------------------------------------------------------
def position_loss(x, threshold=0.1, loss_weight=1.0):
    """Pallas equivalent of position_loss.forward for x of shape (N, D)."""
    x = x.astype(jnp.float32)
    n, d = x.shape

    # --- square T x T blocks: T multiple of 128, capped at 512, padding kept
    #     to < one 128-lane group beyond what the block count forces. ---------
    m = -(-n // 128)                 # number of 128-point groups
    num_blk = -(-m // 4)             # blocks per axis (block width <= 512)
    t = 128 * (-(-m // num_blk))     # block size, multiple of 128, <= 512
    n_pad = num_blk * t

    if n_pad != n:
        # Sentinel padding: sentinel<->real distances >> threshold (hinge 0),
        # sentinel<->sentinel distances exactly 0 (excluded by dist2 != 0).
        sentinel = jnp.full((n_pad - n, d), 1e6, jnp.float32)
        x_pad = jnp.concatenate([x, sentinel], axis=0)
    else:
        x_pad = x
    x_t = x_pad.T                                           # (D, n_pad)

    # Upper-triangular block-pair schedule (scalar prefetch -> SMEM).
    ii_list, jj_list = [], []
    for a in range(num_blk):
        for b in range(a, num_blk):
            ii_list.append(a)
            jj_list.append(b)
    num_pairs = num_blk * (num_blk + 1) // 2
    ii = jnp.asarray(ii_list, jnp.int32)
    jj = jnp.asarray(jj_list, jnp.int32)

    # Denominator uses the ORIGINAL point count: the reference tensor after
    # .norm(dim=-1) is (N, N), so x.shape[0] * x.shape[1] == N * N.
    scale = float(loss_weight) / float(n * n)

    kernel = functools.partial(_position_loss_kernel,
                               threshold=float(threshold), scale=scale)

    grid_spec = pltpu.PrefetchScalarGridSpec(
        num_scalar_prefetch=2,
        grid=(num_pairs,),
        in_specs=[
            pl.BlockSpec((t, d), lambda p, ii_r, jj_r: (ii_r[p], 0)),  # rows
            pl.BlockSpec((d, t), lambda p, ii_r, jj_r: (0, jj_r[p])),  # cols^T
        ],
        out_specs=pl.BlockSpec(memory_space=pltpu.MemorySpace.SMEM),
        scratch_shapes=[pltpu.VMEM((t, t), jnp.float32)],
    )

    out = pl.pallas_call(
        kernel,
        out_shape=jax.ShapeDtypeStruct((1, 1), jnp.float32),
        grid_spec=grid_spec,
        compiler_params=pltpu.CompilerParams(
            dimension_semantics=("arbitrary",),        # accumulation axis
            vmem_limit_bytes=32 * 1024 * 1024),        # safe on v5e/v6e/v7x
    )(ii, jj, x_pad, x_t)
    return out[0, 0]


# -----------------------------------------------------------------------------
# Pure-JAX reference (mirror of the PyTorch forward) for validation
# -----------------------------------------------------------------------------
def _position_loss_ref(x, threshold=0.1, loss_weight=1.0):
    diff = x[None, :, :] - x[:, None, :]
    dist = jnp.sqrt(jnp.sum(diff * diff, axis=-1))
    pos = jnp.logical_and(dist != 0.0, dist <= threshold)
    val = (threshold - dist) * pos.astype(dist.dtype)
    return val.sum() / (dist.shape[0] * dist.shape[1]) * loss_weight


# -----------------------------------------------------------------------------
# Main
# -----------------------------------------------------------------------------
if __name__ == "__main__":
    key = jax.random.PRNGKey(0)

    N, D = 64, 3                 # small: 64 3-D positions
    threshold = 0.1
    loss_weight = 1.0

    # positions in [-0.5, 0.5]^3 so several pairs fall within the threshold
    x = jax.random.uniform(key, (N, D), jnp.float32, -0.5, 0.5)

    loss = position_loss(x, threshold=threshold, loss_weight=loss_weight)
    loss = jax.block_until_ready(loss)

    ref = jax.block_until_ready(
        _position_loss_ref(x, threshold=threshold, loss_weight=loss_weight))

    assert loss.shape == ()
    assert bool(jnp.isfinite(loss)), "non-finite loss"
    assert abs(float(loss) - float(ref)) <= 1e-5 + 1e-3 * abs(float(ref)), (
        float(loss), float(ref))
    print("KERNEL_OK")
</pallas_src>

<mosaic_0001>
module attributes {stable_mosaic.version = 11 : i64} {
  func.func @_position_loss_kernel(%arg0: i32, %arg1: memref<1xi32, #tpu.memory_space<smem>>, %arg2: memref<1xi32, #tpu.memory_space<smem>>, %arg3: memref<128x3xf32, #tpu.memory_space<vmem>>, %arg4: memref<3x128xf32, #tpu.memory_space<vmem>>, %arg5: memref<1x1xf32, #tpu.memory_space<smem>>, %arg6: memref<128x128xf32, #tpu.memory_space<vmem>>) attributes {dimension_semantics = [#tpu.dimension_semantics<arbitrary>], iteration_bounds = array<i64: 1>, scalar_prefetch = 2 : i64, scratch_operands = 1 : i64, tpu.core_type = #tpu.core_type<tc>, window_params = [{transform_indices = @transform_0, window_bounds = array<i64: 128, 3>}, {transform_indices = @transform_1, window_bounds = array<i64: 3, 128>}, {transform_indices = @transform_2, window_bounds = array<i64: 1, 1>}]} {
    %c0_i32 = arith.constant 0 : i32
    %0 = arith.cmpi eq, %arg0, %c0_i32 : i32
    %1 = arith.extui %0 : i1 to i32
    %c0_i32_0 = arith.constant 0 : i32
    %2 = arith.cmpi ne, %1, %c0_i32_0 : i32
    scf.if %2 {
      %cst_16 = arith.constant 0.000000e+00 : f32
      %50 = vector.broadcast %cst_16 : f32 to vector<128x128xf32>
      %c0_17 = arith.constant 0 : index
      %c0_18 = arith.constant 0 : index
      %51 = vector.load %arg6[%c0_17, %c0_18] : memref<128x128xf32, #tpu.memory_space<vmem>>, vector<128x128xf32>
      tpu.vector_store %arg6[%c0_17, %c0_18], %50 {strides = array<i32>} : memref<128x128xf32, #tpu.memory_space<vmem>>, vector<128x128xf32>,
    } else {
    }
    %c0 = arith.constant 0 : index
    %c0_1 = arith.constant 0 : index
    %3 = vector.load %arg3[%c0, %c0_1] : memref<128x3xf32, #tpu.memory_space<vmem>>, vector<128x3xf32>
    %c0_2 = arith.constant 0 : index
    %c0_3 = arith.constant 0 : index
    %4 = vector.load %arg4[%c0_2, %c0_3] : memref<3x128xf32, #tpu.memory_space<vmem>>, vector<3x128xf32>
    %cst = arith.constant 0.000000e+00 : f32
    %5 = vector.broadcast %cst : f32 to vector<128x128xf32>
    %6 = vector.extract_strided_slice %3 {offsets = [0, 0], sizes = [128, 1], strides = [1, 1]} : vector<128x3xf32> to vector<128x1xf32>
    %7 = vector.extract_strided_slice %4 {offsets = [0, 0], sizes = [1, 128], strides = [1, 1]} : vector<3x128xf32> to vector<1x128xf32>
    %8 = vector.broadcast %6 : vector<128x1xf32> to vector<128x128xf32>
    %9 = vector.broadcast %7 : vector<1x128xf32> to vector<128x128xf32>
    %10 = arith.subf %8, %9 : vector<128x128xf32>
    %11 = arith.mulf %10, %10 : vector<128x128xf32>
    %12 = arith.addf %5, %11 : vector<128x128xf32>
    %13 = vector.extract_strided_slice %3 {offsets = [0, 1], sizes = [128, 1], strides = [1, 1]} : vector<128x3xf32> to vector<128x1xf32>
    %14 = vector.extract_strided_slice %4 {offsets = [1, 0], sizes = [1, 128], strides = [1, 1]} : vector<3x128xf32> to vector<1x128xf32>
    %15 = vector.broadcast %13 : vector<128x1xf32> to vector<128x128xf32>
    %16 = vector.broadcast %14 : vector<1x128xf32> to vector<128x128xf32>
    %17 = arith.subf %15, %16 : vector<128x128xf32>
    %18 = arith.mulf %17, %17 : vector<128x128xf32>
    %19 = arith.addf %12, %18 : vector<128x128xf32>
    %20 = vector.extract_strided_slice %3 {offsets = [0, 2], sizes = [128, 1], strides = [1, 1]} : vector<128x3xf32> to vector<128x1xf32>
    %21 = vector.extract_strided_slice %4 {offsets = [2, 0], sizes = [1, 128], strides = [1, 1]} : vector<3x128xf32> to vector<1x128xf32>
    %22 = vector.broadcast %20 : vector<128x1xf32> to vector<128x128xf32>
    %23 = vector.broadcast %21 : vector<1x128xf32> to vector<128x128xf32>
    %24 = arith.subf %22, %23 : vector<128x128xf32>
    %25 = arith.mulf %24, %24 : vector<128x128xf32>
    %26 = arith.addf %19, %25 : vector<128x128xf32>
    %27 = math.sqrt %26 : vector<128x128xf32>
    %cst_4 = arith.constant 0.000000e+00 : f32
    %28 = vector.broadcast %cst_4 : f32 to vector<128x128xf32>
    %29 = arith.cmpf one, %26, %28 : vector<128x128xf32>
    %cst_5 = arith.constant 1.000000e-01 : f32
    %30 = vector.broadcast %cst_5 : f32 to vector<128x128xf32>
    %31 = arith.subf %30, %27 : vector<128x128xf32>
    %cst_6 = arith.constant 0.000000e+00 : f32
    %32 = vector.broadcast %cst_6 : f32 to vector<128x128xf32>
    %33 = arith.maximumf %31, %32 : vector<128x128xf32>
    %cst_7 = arith.constant 0.000000e+00 : f32
    %34 = vector.broadcast %cst_7 : f32 to vector<128x128xf32>
    %35 = arith.select %29, %33, %34 : vector<128x128xi1>, vector<128x128xf32>
    %36 = arith.index_cast %arg0 : i32 to index
    %37 = memref.load %arg1[%36] : memref<1xi32, #tpu.memory_space<smem>>
    %38 = arith.index_cast %arg0 : i32 to index
    %39 = memref.load %arg2[%38] : memref<1xi32, #tpu.memory_space<smem>>
    %40 = arith.cmpi eq, %37, %39 : i32
    %cst_8 = arith.constant 1.000000e+00 : f32
    %cst_9 = arith.constant 2.000000e+00 : f32
    %41 = arith.select %40, %cst_8, %cst_9 : f32
    %c0_10 = arith.constant 0 : index
    %c0_11 = arith.constant 0 : index
    %42 = vector.load %arg6[%c0_10, %c0_11] : memref<128x128xf32, #tpu.memory_space<vmem>>, vector<128x128xf32>
    %43 = vector.broadcast %41 : f32 to vector<128x128xf32>
    %44 = arith.mulf %43, %35 : vector<128x128xf32>
    %45 = arith.addf %42, %44 : vector<128x128xf32>
    %c0_12 = arith.constant 0 : index
    %c0_13 = arith.constant 0 : index
    %46 = vector.load %arg6[%c0_12, %c0_13] : memref<128x128xf32, #tpu.memory_space<vmem>>, vector<128x128xf32>
    tpu.vector_store %arg6[%c0_12, %c0_13], %45 {strides = array<i32>} : memref<128x128xf32, #tpu.memory_space<vmem>>, vector<128x128xf32>,
    %c0_i32_14 = arith.constant 0 : i32
    %47 = arith.cmpi eq, %arg0, %c0_i32_14 : i32
    %48 = arith.extui %47 : i1 to i32
    %c0_i32_15 = arith.constant 0 : i32
    %49 = arith.cmpi ne, %48, %c0_i32_15 : i32
    scf.if %49 {
      %c0_16 = arith.constant 0 : index
      %c0_17 = arith.constant 0 : index
      %50 = vector.load %arg6[%c0_16, %c0_17] : memref<128x128xf32, #tpu.memory_space<vmem>>, vector<128x128xf32>
      %51 = vector.shape_cast %50 : vector<128x128xf32> to vector<1x128x128xf32>
      %cst_18 = arith.constant dense<0.000000e+00> : vector<1xf32>
      %52 = vector.multi_reduction <add>, %51, %cst_18 [1, 2] : vector<1x128x128xf32> to vector<1xf32>
      %53 = vector.shape_cast %52 : vector<1xf32> to vector<1x1x1xf32>
      %54 = vector.extract %53[0, 0, 0] : f32 from vector<1x1x1xf32>
      %cst_19 = arith.constant 2.44140625E-4 : f32
      %55 = arith.mulf %cst_19, %54 : f32
      %c0_20 = arith.constant 0 : index
      %c0_21 = arith.constant 0 : index
      %56 = memref.load %arg5[%c0_20, %c0_21] : memref<1x1xf32, #tpu.memory_space<smem>>
      memref.store %55, %arg5[%c0_20, %c0_21] : memref<1x1xf32, #tpu.memory_space<smem>>
    } else {
    }
    return
  }
  func.func @transform_0(%arg0: i32, %arg1: memref<1xi32, #tpu.memory_space<smem>>, %arg2: memref<1xi32, #tpu.memory_space<smem>>) -> (i32, i32) {
    %0 = arith.index_cast %arg0 : i32 to index
    %1 = memref.load %arg1[%0] : memref<1xi32, #tpu.memory_space<smem>>
    %c0_i32 = arith.constant 0 : i32
    %c0_i32_0 = arith.constant 0 : i32
    return %1, %c0_i32 : i32, i32
  }
  func.func @transform_1(%arg0: i32, %arg1: memref<1xi32, #tpu.memory_space<smem>>, %arg2: memref<1xi32, #tpu.memory_space<smem>>) -> (i32, i32) {
    %0 = arith.index_cast %arg0 : i32 to index
    %1 = memref.load %arg2[%0] : memref<1xi32, #tpu.memory_space<smem>>
    %c0_i32 = arith.constant 0 : i32
    %c0_i32_0 = arith.constant 0 : i32
    return %c0_i32, %1 : i32, i32
  }
  func.func @transform_2(%arg0: i32, %arg1: memref<1xi32, #tpu.memory_space<smem>>, %arg2: memref<1xi32, #tpu.memory_space<smem>>) -> (i32, i32) {
    %c0_i32 = arith.constant 0 : i32
    %c0_i32_0 = arith.constant 0 : i32
    %c0_i32_1 = arith.constant 0 : i32
    return %c0_i32, %c0_i32_0 : i32, i32
  }
}

</mosaic_0001>

<bundles_post_ra>
// kernel: tpu_custom_call.1
= control target key start
LH: loop header
LB: loop body
LE: loop exit
PB: predicated region body
PF: predicated region fallthrough
CT: control target
= control target key end

     0   :  { %v855_v0 = vmov 2   ;;  %v856_v1 = vmov 1   ;;  %s1230_s0 = inlined_call_operand.<no memory space> [shape: s32[1], index: 0, kind: input, shape index: {}]   ;;  %s1231_s1 = inlined_call_operand.<no memory space> [shape: s32[1], index: 1, kind: input, shape index: {}]   ;;  %s1232_s2 = inlined_call_operand.vmem [shape: f32[128,3], index: 2, kind: input, shape index: {}]   ;;  %s1233_s3 = inlined_call_operand.vmem [shape: f32[3,128], index: 3, kind: input, shape index: {}]   ;;  %s1234_s4 = inlined_call_operand.hbm [shape: f32[1,1], index: 4, kind: output, shape index: {}]  }
   0x1   :  { %s772_s17 = sshll.u32 %s1230_s0, 4  ;;  %782 = vset.pattern.permute.xlu0 %v855_v0  ;;  %781 = vset.pattern.permute.xlu1 %v856_v1 }
   0x2   :  { %p43_p0 = scmp.lt.s32.totalorder %s772_s17, 15 }
   0x3   :  { %11 = vsyncpa [#allocation7], 0  ;;  %v857_v10 = vmov 0   ;;  %p50_p1 = scmp.lt.s32.totalorder %s1231_s1, 0  ;;  %v172_v31 = vlaneseq  ;;  %p634_p2 = scmp.eq.s32.totalorder %s1230_s0, %s1231_s1 }
   0x4   :  { %s1236_s17 = smov (!%p43_p0, %s772_s17), 15  ;;  %s843_s10 = scalar_lea.hbm %s1234_s4, 16 }
   0x5   :  { %s773_s18 = sshll.u32 %s1236_s17, 3  ;;  %v173_v34 = vshrl.u32 %v172_v31, 7  ;;  %p844_p3 = scmp.ne.s32.totalorder %s1234_s4, %s843_s10 }
   0x6   :  { %s892_s21 = scalar_lea.vmem %s1232_s2, %s773_s18  ;;  %p847_p4 = scmp.lt.u32.totalorder %s843_s10, %s1234_s4 }
   0x7   :  { %v75_v2 = vld [vmem:[%s892_s21] sm:$0xff]  ;;  %v80_v3 = vld [vmem:[%s892_s21 + $0x28] sm:$0xff]  ;;  %v81_v5 = vld [vmem:[%s892_s21 + $0x30] sm:$0xff]  ;;  %s51_s25 = scalar_select %p50_p1, %s1231_s1, 0  ;;  %v290_v36 = vsub.s32 1, %v173_v34  ;;  %v174_v37 = vsub.s32 0, %v173_v34 }
   0x8   :  { %341 = vperm.xlu0 %782, %v75_v2   ;;  %225 = vperm.xlu1 %781, %v75_v2   ;;  %v76_v4 = vld [vmem:[%s892_s21 + $0x8] sm:$0xff]  ;;  %v77_v6 = vld [vmem:[%s892_s21 + $0x10] sm:$0xff]  ;;  %v86_v8 = vld [vmem:[%s892_s21 + $0x58] sm:$0xff]  ;;  %v406_v41 = vsub.s32 2, %v173_v34  ;;  %s635_s7 = scalar_select %p634_p2, 1.0, 2.0 }
   0x9   :  { %v85_v7 = vld [vmem:[%s892_s21 + $0x50] sm:$0xff]  ;;  %v78_v9 = vld [vmem:[%s892_s21 + $0x18] sm:$0xff]  ;;  %v79_v11 = vld [vmem:[%s892_s21 + $0x20] sm:$0xff]  ;;  %s774_s26 = sshll.u32 %s51_s25, 2  ;;  %p849_p5 = pnand %p847_p4, %p844_p3 }
   0xa   :  { %v83_v12 = vld [vmem:[%s892_s21 + $0x40] sm:$0xff]  ;;  %v84_v13 = vld [vmem:[%s892_s21 + $0x48] sm:$0xff]  ;;  %v89_v15 = vld [vmem:[%s892_s21 + $0x70] sm:$0xff]  ;;  %s53_s29 = scalar_lea.vmem %s1233_s3, %s774_s26 }
   0xb   :  { %v88_v14 = vld [vmem:[%s892_s21 + $0x68] sm:$0xff]  ;;  %v82_v16 = vld [vmem:[%s892_s21 + $0x38] sm:$0xff]  ;;  %v87_v18 = vld [vmem:[%s892_s21 + $0x60] sm:$0xff] }
   0xc   :  { %361 = vperm.xlu0 %782, %v80_v3   ;;  %229 = vperm.xlu1 %781, %v76_v4   ;;  %v90_v17 = vld [vmem:[%s892_s21 + $0x78] sm:$0xff]  ;;  %v91_v40 = vld [vmem:[%s53_s29] sm:$0x7] }
   0xd   :  { %v963_v42 = vrot.slane %v91_v40, %v290_v36  ;;  %v965_v43 = vrot.slane %v91_v40, %v174_v37  ;;  %v971_v46 = vrot.slane %v91_v40, %v406_v41 }
  0x10   :  { %365 = vperm.xlu0 %782, %v81_v5   ;;  %233 = vperm.xlu1 %781, %v77_v6  }
  0x14   :  { %381 = vperm.xlu0 %782, %v85_v7   ;;  %783 = vset.pattern.permute.xlu1 %v855_v0 }
  0x15   :  { %345 = vperm.xlu1 %783, %v76_v4  }
  0x18   :  { %385 = vperm.xlu0 %782, %v86_v8  }
  0x19   :  { %784 = vset.pattern.permute.xlu1 %v857_v10 }
  0x1a   :  { %109 = vperm.xlu1 %784, %v78_v9  }
  0x1c   :  { %802 = vset.pattern.permute.xlu0 %v856_v1 }
  0x1d   :  { %237 = vperm.xlu0 %802, %v78_v9  }
  0x1e   :  { %785 = vset.pattern.permute.xlu1 %v855_v0 }
  0x1f   :  { %349 = vperm.xlu1 %785, %v77_v6  }
  0x21   :  { %241 = vperm.xlu0 %802, %v79_v11  }
  0x23   :  { %786 = vset.pattern.permute.xlu1 %v857_v10 }
  0x24   :  { %114 = vperm.xlu1 %786, %v79_v11  }
  0x25   :  { %257 = vperm.xlu0 %802, %v83_v12  }
  0x28   :  { %787 = vset.pattern.permute.xlu1 %v855_v0 }
  0x29   :  { %261 = vperm.xlu0 %802, %v84_v13   ;;  %353 = vperm.xlu1 %787, %v78_v9  }
  0x2d   :  { %277 = vperm.xlu0 %802, %v88_v14   ;;  %788 = vset.pattern.permute.xlu1 %v856_v1 }
  0x2e   :  { %245 = vperm.xlu1 %788, %v80_v3  }
  0x31   :  { %281 = vperm.xlu0 %802, %v89_v15  }
  0x32   :  { %789 = vset.pattern.permute.xlu1 %v855_v0 }
  0x33   :  { %357 = vperm.xlu1 %789, %v79_v11  }
  0x35   :  { %806 = vset.pattern.permute.xlu0 %v857_v10 }
  0x36   :  { %94 = vperm.xlu0 %806, %v75_v2  }
  0x37   :  { %790 = vset.pattern.permute.xlu1 %v856_v1 }
  0x38   :  { %249 = vperm.xlu1 %790, %v81_v5  }
  0x3a   :  { %99 = vperm.xlu0 %806, %v76_v4  }
  0x3c   :  { %791 = vset.pattern.permute.xlu1 %v857_v10 }
  0x3d   :  { %129 = vperm.xlu1 %791, %v82_v16  }
  0x3e   :  { %104 = vperm.xlu0 %806, %v77_v6  }
  0x41   :  { %792 = vset.pattern.permute.xlu1 %v856_v1 }
  0x42   :  { %119 = vperm.xlu0 %806, %v80_v3   ;;  %253 = vperm.xlu1 %792, %v82_v16  }
  0x46   :  { %124 = vperm.xlu0 %806, %v81_v5   ;;  %793 = vset.pattern.permute.xlu1 %v857_v10 }
  0x47   :  { %134 = vperm.xlu1 %793, %v83_v12  }
  0x4a   :  { %144 = vperm.xlu0 %806, %v85_v7  }
  0x4b   :  { %794 = vset.pattern.permute.xlu1 %v855_v0 }
  0x4c   :  { %369 = vperm.xlu1 %794, %v82_v16  }
  0x4e   :  { %149 = vperm.xlu0 %806, %v86_v8  }
  0x50   :  { %795 = vset.pattern.permute.xlu1 %v857_v10 }
  0x51   :  { %139 = vperm.xlu1 %795, %v84_v13  }
  0x52   :  { %169 = vperm.xlu0 %806, %v90_v17  }
  0x55   :  { %796 = vset.pattern.permute.xlu1 %v855_v0 }
  0x56   :  { %373 = vperm.xlu1 %796, %v83_v12   ;;  %810 = vset.pattern.permute.xlu0 %v855_v0 }
  0x57   :  { %401 = vperm.xlu0 %810, %v90_v17  }
  0x5a   :  { %797 = vset.pattern.permute.xlu1 %v856_v1 }
  0x5b   :  { %265 = vperm.xlu1 %797, %v85_v7  }
  0x5f   :  { %798 = vset.pattern.permute.xlu1 %v855_v0 }
  0x60   :  { %377 = vperm.xlu1 %798, %v84_v13  }
  0x64   :  { %799 = vset.pattern.permute.xlu1 %v856_v1 }
  0x65   :  { %269 = vperm.xlu1 %799, %v86_v8  }
  0x69   :  { %800 = vset.pattern.permute.xlu1 %v857_v10 }
  0x6a   :  { %154 = vperm.xlu1 %800, %v87_v18  }
  0x6e   :  { %801 = vset.pattern.permute.xlu1 %v856_v1 }
  0x6f   :  { %273 = vperm.xlu1 %801, %v87_v18  }
  0x73   :  { %803 = vset.pattern.permute.xlu1 %v857_v10 }
  0x74   :  { %159 = vperm.xlu1 %803, %v88_v14  }
  0x78   :  { %804 = vset.pattern.permute.xlu1 %v855_v0 }
  0x79   :  { %389 = vperm.xlu1 %804, %v87_v18  }
  0x7d   :  { %805 = vset.pattern.permute.xlu1 %v857_v10 }
  0x7e   :  { %164 = vperm.xlu1 %805, %v89_v15  }
  0x82   :  { %807 = vset.pattern.permute.xlu1 %v855_v0 }
  0x83   :  { %393 = vperm.xlu1 %807, %v88_v14  }
  0x87   :  { %808 = vset.pattern.permute.xlu1 %v856_v1  ;;  %v226_v19 = vpop.permute.xlu1 %225  ;;  %v342_v20 = vpop.permute.xlu0 %341 }
  0x88   :  { %285 = vperm.xlu1 %808, %v90_v17   ;;  %v292_v53 = vsub.f32 %v226_v19, %v963_v42  ;;  %v408_v54 = vsub.f32 %v342_v20, %v971_v46 }
  0x8a   :  { %v308_v61 = vmul.f32 %v292_v53, %v292_v53  ;;  %v424_v62 = vmul.f32 %v408_v54, %v408_v54 }
  0x8b   :  { %v230_v21 = vpop.permute.xlu1 %229  ;;  %v937_v22 = vpop.permute.xlu0 %361 }
  0x8c   :  { %809 = vset.pattern.permute.xlu1 %v855_v0  ;;  %v293_v1 = vsub.f32 %v230_v21, %v963_v42 }
  0x8d   :  { %397 = vperm.xlu1 %809, %v89_v15  }
  0x8e   :  { %v309_v9 = vmul.f32 %v293_v1, %v293_v1 }
  0x8f   :  { %v234_v23 = vpop.permute.xlu1 %233  ;;  %v940_v24 = vpop.permute.xlu0 %365 }
  0x90   :  { %v294_v11 = vsub.f32 %v234_v23, %v963_v42 }
  0x92   :  { %v310_v18 = vmul.f32 %v294_v11, %v294_v11 }
  0x93   :  { %v942_v25 = vpop.permute.xlu0 %381 }
  0x94   :  { %v346_v26 = vpop.permute.xlu1 %345 }
  0x95   :  { %v409_v5 = vsub.f32 %v346_v26, %v971_v46 }
  0x97   :  { %v944_v27 = vpop.permute.xlu0 %385  ;;  %v425_v12 = vmul.f32 %v409_v5, %v409_v5 }
  0x99   :  { %v110_v28 = vpop.permute.xlu1 %109 }
  0x9a   :  { %v179_v48 = vsub.f32 %v110_v28, %v965_v43 }
  0x9c   :  { %v238_v29 = vpop.permute.xlu0 %237  ;;  %v195_v55 = vmul.f32 %v179_v48, %v179_v48 }
  0x9d   :  { %v295_v47 = vsub.f32 %v238_v29, %v963_v42 }
  0x9e   :  { %v350_v30 = vpop.permute.xlu1 %349 }
  0x9f   :  { %v311_v51 = vmul.f32 %v295_v47, %v295_v47  ;;  %v410_v14 = vsub.f32 %v350_v30, %v971_v46 }
  0xa0   :  { %v952_v32 = vpop.permute.xlu0 %241 }
  0xa1   :  { %v327_v58 = vadd.f32 %v311_v51, %v195_v55  ;;  %v426_v20 = vmul.f32 %v410_v14, %v410_v14 }
  0xa3   :  { %v954_v33 = vpop.permute.xlu1 %114 }
  0xa4   :  { %v956_v35 = vpop.permute.xlu0 %257 }
  0xa8   :  { %v354_v38 = vpop.permute.xlu1 %353  ;;  %v961_v39 = vpop.permute.xlu0 %261 }
  0xa9   :  { %v411_v49 = vsub.f32 %v354_v38, %v971_v46 }
  0xab   :  { %v427_v56 = vmul.f32 %v411_v49, %v411_v49 }
  0xac   :  { %v967_v44 = vpop.permute.xlu0 %277 }
  0xad   :  { %v969_v45 = vpop.permute.xlu1 %245  ;;  %v985_v63 = vadd.f32 %v427_v56, %v327_v58 }
  0xaf   :  { %811 = vrsqrt.f32 %v985_v63  ;;  %vm479_vm2 = vcmp.eq.f32.partialorder %v985_v63, inf  ;;  %v482_v48 = vand.u32 2147483648, %v985_v63  ;;  %vm481_vm3 = vcmp.eq.f32.partialorder %v985_v63, 0.0 }
  0xb0   :  { %v976_v50 = vpop.permute.xlu0 %281  ;;  %vm571_vm11 = vcmp.ne.f32.partialorder %v985_v63, 0.0 }
  0xb2   :  { %v978_v52 = vpop.permute.xlu1 %357 }
  0xb5   :  { %v95_v57 = vpop.permute.xlu0 %94 }
  0xb6   :  { %v176_v59 = vsub.f32 %v95_v57, %v965_v43 }
  0xb7   :  { %v983_v60 = vpop.permute.xlu1 %249 }
  0xb8   :  { %v192_v0 = vmul.f32 %v176_v59, %v176_v59 }
  0xb9   :  { %v100_v2 = vpop.permute.xlu0 %99  ;;  %v812_v26 = vpop.eup %811 }
  0xba   :  { %v324_v3 = vadd.f32 %v308_v61, %v192_v0  ;;  %v177_v4 = vsub.f32 %v100_v2, %v965_v43  ;;  %v478_v30 = vmul.f32 %v812_v26, %v985_v63  ;;  %v296_v61 = vsub.f32 %v952_v32, %v963_v42 }
  0xbc   :  { %v440_v6 = vadd.f32 %v424_v62, %v324_v3  ;;  %v193_v7 = vmul.f32 %v177_v4, %v177_v4  ;;  %v991_v8 = vpop.permute.xlu1 %129  ;;  %v480_v41 = vsel %vm479_vm2, %v985_v63, %v478_v30  ;;  %v180_v62 = vsub.f32 %v954_v33, %v965_v43 }
  0xbd   :  { %v105_v10 = vpop.permute.xlu0 %104  ;;  %v483_v53 = vsel %vm481_vm3, %v482_v48, %v480_v41  ;;  %v412_v33 = vsub.f32 %v978_v52, %v971_v46 }
  0xbe   :  { %813 = vrsqrt.f32 %v440_v6  ;;  %v325_v13 = vadd.f32 %v309_v9, %v193_v7  ;;  %v178_v15 = vsub.f32 %v105_v10, %v965_v43  ;;  %vm458_vm0 = vcmp.eq.f32.partialorder %v440_v6, inf }
  0xbf   :  { %v461_v34 = vand.u32 2147483648, %v440_v6  ;;  %vm460_vm1 = vcmp.eq.f32.partialorder %v440_v6, 0.0  ;;  %v587_v0 = vsub.f32 0.1, %v483_v53  ;;  %vm568_vm6 = vcmp.ne.f32.partialorder %v440_v6, 0.0 }
  0xc0   :  { %v441_v16 = vadd.f32 %v425_v12, %v325_v13  ;;  %v194_v19 = vmul.f32 %v178_v15, %v178_v15  ;;  %v1030_v12 = vstv %s635_s7  ;;  %v312_v13 = vmul.f32 %v296_v61, %v296_v61 }
  0xc1   :  { %v996_v17 = vpop.permute.xlu1 %253  ;;  %v120_v4 = vpop.permute.xlu0 %119  ;;  %v196_v14 = vmul.f32 %v180_v62, %v180_v62 }
  0xc2   :  { %815 = vrsqrt.f32 %v441_v16  ;;  %v326_v21 = vadd.f32 %v310_v18, %v194_v19  ;;  %vm465_vm4 = vcmp.eq.f32.partialorder %v441_v16, inf  ;;  %v468_v51 = vand.u32 2147483648, %v441_v16 }
  0xc3   :  { %vm467_vm5 = vcmp.eq.f32.partialorder %v441_v16, 0.0  ;;  %vm569_vm8 = vcmp.ne.f32.partialorder %v441_v16, 0.0  ;;  %v297_v18 = vsub.f32 %v969_v45, %v963_v42 }
  0xc4   :  { %v998_v28 = vadd.f32 %v426_v20, %v326_v21  ;;  %v603_v20 = vmax.f32 %v587_v0, 0.0  ;;  %v428_v21 = vmul.f32 %v412_v33, %v412_v33 }
  0xc5   :  { %v125_v52 = vpop.permute.xlu0 %124 }
  0xc6   :  { %v1000_v29 = vpop.permute.xlu1 %134  ;;  %817 = vrsqrt.f32 %v998_v28  ;;  %vm472_vm7 = vcmp.eq.f32.partialorder %v998_v28, inf  ;;  %v475_v3 = vand.u32 2147483648, %v998_v28  ;;  %vm474_vm9 = vcmp.eq.f32.partialorder %v998_v28, 0.0 }
  0xc7   :  { %vm570_vm10 = vcmp.ne.f32.partialorder %v998_v28, 0.0  ;;  %v182_v45 = vsub.f32 %v125_v52, %v965_v43  ;;  %v619_v41 = vsel %vm571_vm11, %v603_v20, 0.0 }
  0xc8   :  { %v814_v23 = vpop.eup %813 }
  0xc9   :  { %v457_v31 = vmul.f32 %v814_v23, %v440_v6 }
  0xcb   :  { %v459_v36 = vsel %vm458_vm0, %v440_v6, %v457_v31  ;;  %v1004_v37 = vpop.permute.xlu1 %369  ;;  %v181_v6 = vsub.f32 %v120_v4, %v965_v43  ;;  %v184_v4 = vsub.f32 %v1000_v29, %v965_v43 }
  0xcc   :  { %v462_v38 = vsel %vm460_vm1, %v461_v34, %v459_v36  ;;  %v816_v40 = vpop.eup %815  ;;  %v328_v34 = vadd.f32 %v312_v13, %v196_v14  ;;  %v415_v61 = vsub.f32 %v1004_v37, %v971_v46 }
  0xcd   :  { %v584_v47 = vsub.f32 0.1, %v462_v38  ;;  %v464_v49 = vmul.f32 %v816_v40, %v441_v16  ;;  %v197_v30 = vmul.f32 %v181_v6, %v181_v6  ;;  %v413_v38 = vsub.f32 %v937_v22, %v971_v46 }
  0xce   :  { %v313_v40 = vmul.f32 %v297_v18, %v297_v18  ;;  %v414_v22 = vsub.f32 %v940_v24, %v971_v46  ;;  %v300_v24 = vsub.f32 %v956_v35, %v963_v42  ;;  %v200_v29 = vmul.f32 %v184_v4, %v184_v4 }
  0xcf   :  { %v466_v54 = vsel %vm465_vm4, %v441_v16, %v464_v49  ;;  %v600_v56 = vmax.f32 %v584_v47, 0.0  ;;  %v1042_v47 = vadd.f32 %v428_v21, %v328_v34  ;;  %v429_v63 = vmul.f32 %v413_v38, %v413_v38 }
  0xd0   :  { %v1016_v55 = vpop.permute.xlu1 %139  ;;  %v469_v57 = vsel %vm467_vm5, %v468_v51, %v466_v54  ;;  %v818_v58 = vpop.eup %817  ;;  %v329_v48 = vadd.f32 %v313_v40, %v197_v30  ;;  %v656_v51 = vmul.f32 %v1030_v12, %v619_v41  ;;  %v299_v54 = vsub.f32 %v996_v17, %v963_v42 }
  0xd1   :  { %v585_v59 = vsub.f32 0.1, %v469_v57  ;;  %v471_v1 = vmul.f32 %v818_v58, %v998_v28  ;;  %v616_v5 = vsel %vm568_vm6, %v600_v56, 0.0  ;;  %v198_v56 = vmul.f32 %v182_v45, %v182_v45 }
  0xd2   :  { %v653_v15 = vmul.f32 %v1030_v12, %v616_v5  ;;  %819 = vrsqrt.f32 %v1042_v47  ;;  %v315_v0 = vmul.f32 %v299_v54, %v299_v54  ;;  %v301_v5 = vsub.f32 %v961_v39, %v963_v42 }
  0xd3   :  { %v601_v2 = vmax.f32 %v585_v59, 0.0  ;;  %v473_v7 = vsel %vm472_vm7, %v998_v28, %v471_v1  ;;  %v298_v28 = vsub.f32 %v983_v60, %v963_v42  ;;  %v183_v60 = vsub.f32 %v991_v8, %v965_v43  ;;  %v145_v1 = vpop.permute.xlu0 %144 }
  0xd4   :  { %v476_v10 = vsel %vm474_vm9, %v475_v3, %v473_v7  ;;  %v1056_v59 = vadd.f32 %v429_v63, %v329_v48  ;;  %v431_v8 = vmul.f32 %v415_v61, %v415_v61  ;;  %v185_v33 = vsub.f32 %v1016_v55, %v965_v43 }
  0xd5   :  { %v374_v32 = vpop.permute.xlu1 %373  ;;  %v617_v9 = vsel %vm569_vm8, %v601_v2, 0.0  ;;  %v586_v11 = vsub.f32 0.1, %v476_v10  ;;  %v314_v58 = vmul.f32 %v298_v28, %v298_v28  ;;  %v430_v2 = vmul.f32 %v414_v22, %v414_v22 }
  0xd6   :  { %v654_v16 = vmul.f32 %v1030_v12, %v617_v9  ;;  %v199_v3 = vmul.f32 %v183_v60, %v183_v60  ;;  %821 = vrsqrt.f32 %v1056_v59  ;;  %v416_v9 = vsub.f32 %v374_v32, %v971_v46 }
  0xd7   :  { %v602_v19 = vmax.f32 %v586_v11, 0.0  ;;  %v330_v17 = vadd.f32 %v314_v58, %v198_v56  ;;  %v150_v10 = vpop.permute.xlu0 %149  ;;  %v186_v11 = vsub.f32 %v145_v1, %v965_v43  ;;  %v316_v13 = vmul.f32 %v300_v24, %v300_v24 }
  0xd8   :  { %v720_v23 = vadd.f32 %v654_v16, %v653_v15  ;;  %v331_v7 = vadd.f32 %v315_v0, %v199_v3  ;;  %v187_v16 = vsub.f32 %v150_v10, %v965_v43  ;;  %v317_v55 = vmul.f32 %v301_v5, %v301_v5 }
  0xd9   :  { %v618_v31 = vsel %vm570_vm10, %v602_v19, 0.0  ;;  %v1067_v37 = vadd.f32 %v430_v2, %v330_v17  ;;  %v201_v32 = vmul.f32 %v185_v33, %v185_v33  ;;  %v432_v19 = vmul.f32 %v416_v9, %v416_v9 }
  0xda   :  { %v266_v26 = vpop.permute.xlu1 %265  ;;  %v655_v36 = vmul.f32 %v1030_v12, %v618_v31  ;;  %v1074_v14 = vadd.f32 %v431_v8, %v331_v7  ;;  %v202_v20 = vmul.f32 %v186_v11, %v186_v11  ;;  %v418_v31 = vsub.f32 %v942_v25, %v971_v46 }
  0xdb   :  { %v302_v6 = vsub.f32 %v266_v26, %v963_v42  ;;  %823 = vrsqrt.f32 %v1067_v37  ;;  %v203_v34 = vmul.f32 %v187_v16, %v187_v16  ;;  %v333_v40 = vadd.f32 %v317_v55, %v201_v32  ;;  %v170_v4 = vpop.permute.xlu0 %169 }
  0xdc   :  { %v721_v53 = vadd.f32 %v720_v23, %v655_v36  ;;  %v820_v15 = vpop.eup %819  ;;  %v332_v23 = vadd.f32 %v316_v13, %v200_v29  ;;  %825 = vrsqrt.f32 %v1074_v14  ;;  %v419_v41 = vsub.f32 %v944_v27, %v971_v46 }
  0xdd   :  { %v318_v21 = vmul.f32 %v302_v6, %v302_v6  ;;  %v485_v26 = vmul.f32 %v820_v15, %v1042_v47  ;;  %vm486_vm12 = vcmp.eq.f32.partialorder %v1042_v47, inf  ;;  %v434_v25 = vmul.f32 %v418_v31, %v418_v31 }
  0xde   :  { %v1052_v57 = vadd.f32 %v721_v53, %v656_v51  ;;  %v1084_v45 = vadd.f32 %v432_v19, %v332_v23  ;;  %v489_v63 = vand.u32 2147483648, %v1042_v47  ;;  %vm488_vm13 = vcmp.eq.f32.partialorder %v1042_v47, 0.0 }
  0xdf   :  { %v378_v49 = vpop.permute.xlu1 %377  ;;  %v334_v28 = vadd.f32 %v318_v21, %v202_v20  ;;  %v487_v48 = vsel %vm486_vm12, %v1042_v47, %v485_v26  ;;  %v435_v22 = vmul.f32 %v419_v41, %v419_v41  ;;  %vm493_vm14 = vcmp.eq.f32.partialorder %v1056_v59, inf  ;;  %v402_v29 = vpop.permute.xlu0 %401 }
  0xe0   :  { %v417_v39 = vsub.f32 %v378_v49, %v971_v46  ;;  %v822_v38 = vpop.eup %821  ;;  %827 = vrsqrt.f32 %v1084_v45  ;;  %v490_v60 = vsel %vm488_vm13, %v489_v63, %v487_v48  ;;  %v496_v24 = vand.u32 2147483648, %v1056_v59 }
  0xe1   :  { %v492_v54 = vmul.f32 %v822_v38, %v1056_v59  ;;  %v1098_v58 = vadd.f32 %v434_v25, %v334_v28  ;;  %v588_v5 = vsub.f32 0.1, %v490_v60  ;;  %v305_v7 = vsub.f32 %v967_v44, %v963_v42 }
  0xe2   :  { %v433_v30 = vmul.f32 %v417_v39, %v417_v39  ;;  %vm495_vm15 = vcmp.eq.f32.partialorder %v1056_v59, 0.0  ;;  %vm500_vm0 = vcmp.eq.f32.partialorder %v1067_v37, inf  ;;  %v306_v16 = vsub.f32 %v976_v50, %v963_v42 }
  0xe3   :  { %v494_v1 = vsel %vm493_vm14, %v1056_v59, %v492_v54  ;;  %v604_v39 = vmax.f32 %v588_v5, 0.0  ;;  %v321_v15 = vmul.f32 %v305_v7, %v305_v7  ;;  %v503_v19 = vand.u32 2147483648, %v1067_v37 }
  0xe4   :  { %v270_v62 = vpop.permute.xlu1 %269  ;;  %v1090_v49 = vadd.f32 %v433_v30, %v333_v40  ;;  %vm507_vm1 = vcmp.eq.f32.partialorder %v1074_v14, inf  ;;  %v191_v20 = vsub.f32 %v170_v4, %v965_v43  ;;  %v423_v21 = vsub.f32 %v402_v29, %v971_v46 }
  0xe5   :  { %v303_v18 = vsub.f32 %v270_v62, %v963_v42  ;;  %v824_v61 = vpop.eup %823  ;;  %vm502_vm2 = vcmp.eq.f32.partialorder %v1067_v37, 0.0  ;;  %vm572_vm3 = vcmp.ne.f32.partialorder %v1042_v47, 0.0  ;;  %v510_v26 = vand.u32 2147483648, %v1074_v14 }
  0xe6   :  { %829 = vrsqrt.f32 %v1090_v49  ;;  %v826_v2 = vpop.eup %825  ;;  %v499_v33 = vmul.f32 %v824_v61, %v1067_v37  ;;  %v620_v31 = vsel %vm572_vm3, %v604_v39, 0.0  ;;  %vm509_vm4 = vcmp.eq.f32.partialorder %v1074_v14, 0.0 }
  0xe7   :  { %v319_v36 = vmul.f32 %v303_v18, %v303_v18  ;;  %831 = vrsqrt.f32 %v1098_v58  ;;  %v506_v11 = vmul.f32 %v826_v2, %v1074_v14  ;;  %v207_v41 = vmul.f32 %v191_v20, %v191_v20 }
  0xe8   :  { %v501_v18 = vsel %vm500_vm0, %v1067_v37, %v499_v33  ;;  %vm573_vm5 = vcmp.ne.f32.partialorder %v1056_v59, 0.0  ;;  %vm574_vm6 = vcmp.ne.f32.partialorder %v1067_v37, 0.0  ;;  %v657_v63 = vmul.f32 %v1030_v12, %v620_v31 }
  0xe9   :  { %v155_v35 = vpop.permute.xlu1 %154  ;;  %v335_v56 = vadd.f32 %v319_v36, %v203_v34  ;;  %v504_v30 = vsel %vm502_vm2, %v503_v19, %v501_v18  ;;  %v322_v34 = vmul.f32 %v306_v16, %v306_v16  ;;  %vm514_vm7 = vcmp.eq.f32.partialorder %v1084_v45, inf }
  0xea   :  { %v188_v27 = vsub.f32 %v155_v35, %v965_v43  ;;  %v497_v35 = vsel %vm495_vm15, %v496_v24, %v494_v1  ;;  %v828_v32 = vpop.eup %827  ;;  %v590_v25 = vsub.f32 0.1, %v504_v30  ;;  %vm516_vm8 = vcmp.eq.f32.partialorder %v1084_v45, 0.0 }
  0xeb   :  { %v1102_v0 = vadd.f32 %v435_v22, %v335_v56  ;;  %v589_v55 = vsub.f32 0.1, %v497_v35  ;;  %v513_v36 = vmul.f32 %v828_v32, %v1084_v45  ;;  %v517_v59 = vand.u32 2147483648, %v1084_v45 }
  0xec   :  { %v204_v3 = vmul.f32 %v188_v27, %v188_v27  ;;  %vm521_vm9 = vcmp.eq.f32.partialorder %v1090_v49, inf  ;;  %vm528_vm10 = vcmp.eq.f32.partialorder %v1098_v58, inf  ;;  %v606_v4 = vmax.f32 %v590_v25, 0.0 }
  0xed   :  { %833 = vrsqrt.f32 %v1102_v0  ;;  %v605_v40 = vmax.f32 %v589_v55, 0.0  ;;  %v515_v22 = vsel %vm514_vm7, %v1084_v45, %v513_v36  ;;  %v524_v5 = vand.u32 2147483648, %v1090_v49 }
  0xee   :  { %v274_v52 = vpop.permute.xlu1 %273  ;;  %vm575_vm11 = vcmp.ne.f32.partialorder %v1074_v14, 0.0  ;;  %vm523_vm12 = vcmp.eq.f32.partialorder %v1090_v49, 0.0  ;;  %vm530_vm13 = vcmp.eq.f32.partialorder %v1098_v58, 0.0  ;;  %vm576_vm14 = vcmp.ne.f32.partialorder %v1084_v45, 0.0 }
  0xef   :  { %v304_v51 = vsub.f32 %v274_v52, %v963_v42  ;;  %v508_v52 = vsel %vm507_vm1, %v1074_v14, %v506_v11  ;;  %v621_v61 = vsel %vm573_vm5, %v605_v40, 0.0  ;;  %vm535_vm15 = vcmp.eq.f32.partialorder %v1102_v0, inf }
  0xf0   :  { %v830_v50 = vpop.eup %829  ;;  %v511_v48 = vsel %vm509_vm4, %v510_v26, %v508_v52  ;;  %v622_v18 = vsel %vm574_vm6, %v606_v4, 0.0  ;;  %v723_v55 = vadd.f32 %v1052_v57, %v657_v63  ;;  %v538_v20 = vand.u32 2147483648, %v1102_v0 }
  0xf1   :  { %v320_v62 = vmul.f32 %v304_v51, %v304_v51  ;;  %v832_v47 = vpop.eup %831  ;;  %v439_v51 = vmul.f32 %v423_v21, %v423_v21  ;;  %v591_v60 = vsub.f32 0.1, %v511_v48  ;;  %vm537_vm0 = vcmp.eq.f32.partialorder %v1102_v0, 0.0 }
  0xf2   :  { %v527_v2 = vmul.f32 %v832_v47, %v1098_v58  ;;  %v658_v31 = vmul.f32 %v1030_v12, %v621_v61  ;;  %vm577_vm3 = vcmp.ne.f32.partialorder %v1090_v49, 0.0  ;;  %vm578_vm6 = vcmp.ne.f32.partialorder %v1098_v58, 0.0 }
  0xf3   :  { %v160_v53 = vpop.permute.xlu1 %159  ;;  %v336_v9 = vadd.f32 %v320_v62, %v204_v3  ;;  %v607_v11 = vmax.f32 %v591_v60, 0.0  ;;  %vm579_vm7 = vcmp.ne.f32.partialorder %v1102_v0, 0.0 }
  0xf4   :  { %v189_v6 = vsub.f32 %v160_v53, %v965_v43  ;;  %v520_v53 = vmul.f32 %v830_v50, %v1090_v49  ;;  %v529_v35 = vsel %vm528_vm10, %v1098_v58, %v527_v2  ;;  %v724_v48 = vadd.f32 %v723_v55, %v658_v31 }
  0xf5   :  { %v623_v36 = vsel %vm575_vm11, %v607_v11, 0.0 }
  0xf6   :  { %v205_v23 = vmul.f32 %v189_v6, %v189_v6  ;;  %v522_v3 = vsel %vm521_vm9, %v1090_v49, %v520_v53  ;;  %v660_v25 = vmul.f32 %v1030_v12, %v623_v36 }
  0xf7   :  { %v834_v27 = vpop.eup %833 }
  0xf8   :  { %v390_v17 = vpop.permute.xlu1 %389  ;;  %v337_v54 = vadd.f32 %v321_v15, %v205_v23  ;;  %v534_v7 = vmul.f32 %v834_v27, %v1102_v0 }
  0xf9   :  { %v420_v8 = vsub.f32 %v390_v17, %v971_v46 }
  0xfa   :  { %v536_v16 = vsel %vm535_vm15, %v1102_v0, %v534_v7 }
  0xfb   :  { %v436_v10 = vmul.f32 %v420_v8, %v420_v8 }
  0xfd   :  { %v1116_v13 = vadd.f32 %v436_v10, %v336_v9  ;;  %v165_v44 = vpop.permute.xlu1 %164  ;;  %v525_v10 = vsel %vm523_vm12, %v524_v5, %v522_v3 }
  0xfe   :  { %v190_v62 = vsub.f32 %v165_v44, %v965_v43  ;;  %v518_v43 = vsel %vm516_vm8, %v517_v59, %v515_v22  ;;  %v593_v21 = vsub.f32 0.1, %v525_v10 }
  0xff   :  { %835 = vrsqrt.f32 %v1116_v13  ;;  %v592_v39 = vsub.f32 0.1, %v518_v43  ;;  %vm542_vm1 = vcmp.eq.f32.partialorder %v1116_v13, inf  ;;  %v545_v23 = vand.u32 2147483648, %v1116_v13 }
 0x100   :  { %v206_v9 = vmul.f32 %v190_v62, %v190_v62  ;;  %vm544_vm2 = vcmp.eq.f32.partialorder %v1116_v13, 0.0  ;;  %vm580_vm10 = vcmp.ne.f32.partialorder %v1116_v13, 0.0 }
 0x101   :  { %v608_v57 = vmax.f32 %v592_v39, 0.0 }
 0x102   :  { %v394_v38 = vpop.permute.xlu1 %393  ;;  %v338_v52 = vadd.f32 %v322_v34, %v206_v9  ;;  %v609_v34 = vmax.f32 %v593_v21, 0.0 }
 0x103   :  { %v421_v28 = vsub.f32 %v394_v38, %v971_v46  ;;  %v659_v38 = vmul.f32 %v1030_v12, %v622_v18 }
 0x105   :  { %v437_v56 = vmul.f32 %v421_v28, %v421_v28  ;;  %v725_v59 = vadd.f32 %v724_v48, %v659_v38 }
 0x107   :  { %v1142_v17 = vadd.f32 %v437_v56, %v337_v54  ;;  %v286_v1 = vpop.permute.xlu1 %285  ;;  %v625_v56 = vsel %vm577_vm3, %v609_v34, 0.0  ;;  %v726_v62 = vadd.f32 %v725_v59, %v660_v25 }
 0x108   :  { %v307_v24 = vsub.f32 %v286_v1, %v963_v42  ;;  %v531_v42 = vand.u32 2147483648, %v1098_v58  ;;  %v662_v61 = vmul.f32 %v1030_v12, %v625_v56 }
 0x109   :  { %v836_v8 = vpop.eup %835  ;;  %837 = vrsqrt.f32 %v1142_v17  ;;  %vm549_vm4 = vcmp.eq.f32.partialorder %v1142_v17, inf  ;;  %v552_v14 = vand.u32 2147483648, %v1142_v17  ;;  %vm551_vm5 = vcmp.eq.f32.partialorder %v1142_v17, 0.0 }
 0x10a   :  { %v323_v33 = vmul.f32 %v307_v24, %v307_v24  ;;  %v541_v29 = vmul.f32 %v836_v8, %v1116_v13  ;;  %v532_v19 = vsel %vm530_vm13, %v531_v42, %v529_v35  ;;  %vm581_vm12 = vcmp.ne.f32.partialorder %v1142_v17, 0.0 }
 0x10b   :  { %v594_v30 = vsub.f32 0.1, %v532_v19 }
 0x10c   :  { %v339_v6 = vadd.f32 %v323_v33, %v207_v41  ;;  %v398_v44 = vpop.permute.xlu1 %397  ;;  %v543_v37 = vsel %vm542_vm1, %v1116_v13, %v541_v29 }
 0x10d   :  { %v422_v15 = vsub.f32 %v398_v44, %v971_v46  ;;  %v539_v46 = vsel %vm537_vm0, %v538_v20, %v536_v16  ;;  %v546_v41 = vsel %vm544_vm2, %v545_v23, %v543_v37  ;;  %v610_v53 = vmax.f32 %v594_v30, 0.0 }
 0x10e   :  { %v1167_v32 = vadd.f32 %v439_v51, %v339_v6  ;;  %v595_v28 = vsub.f32 0.1, %v539_v46  ;;  %v624_v51 = vsel %vm576_vm14, %v608_v57, 0.0  ;;  %v596_v54 = vsub.f32 0.1, %v546_v41 }
 0x10f   :  { %v438_v50 = vmul.f32 %v422_v15, %v422_v15  ;;  %v661_v49 = vmul.f32 %v1030_v12, %v624_v51  ;;  %v626_v60 = vsel %vm578_vm6, %v610_v53, 0.0 }
 0x110   :  { %839 = vrsqrt.f32 %v1167_v32  ;;  %v611_v22 = vmax.f32 %v595_v28, 0.0  ;;  %v612_v2 = vmax.f32 %v596_v54, 0.0  ;;  %vm563_vm8 = vcmp.eq.f32.partialorder %v1167_v32, inf }
 0x111   :  { %v1176_v26 = vadd.f32 %v438_v50, %v338_v52  ;;  %v727_v4 = vadd.f32 %v726_v62, %v661_v49  ;;  %v566_v8 = vand.u32 2147483648, %v1167_v32  ;;  %v663_v58 = vmul.f32 %v1030_v12, %v626_v60 }
 0x112   :  { %v627_v3 = vsel %vm579_vm7, %v611_v22, 0.0  ;;  %vm565_vm9 = vcmp.eq.f32.partialorder %v1167_v32, 0.0  ;;  %v628_v9 = vsel %vm580_vm10, %v612_v2, 0.0  ;;  %vm583_vm15 = vcmp.ne.f32.partialorder %v1167_v32, 0.0 }
 0x113   :  { %v838_v40 = vpop.eup %837  ;;  %841 = vrsqrt.f32 %v1176_v26  ;;  %v728_v0 = vadd.f32 %v727_v4, %v662_v61  ;;  %v664_v10 = vmul.f32 %v1030_v12, %v627_v3  ;;  %vm556_vm11 = vcmp.eq.f32.partialorder %v1176_v26, inf }
 0x114   :  { %v548_v47 = vmul.f32 %v838_v40, %v1142_v17  ;;  %v559_v35 = vand.u32 2147483648, %v1176_v26  ;;  %vm558_vm13 = vcmp.eq.f32.partialorder %v1176_v26, 0.0  ;;  %v665_v29 = vmul.f32 %v1030_v12, %v628_v9 }
 0x115   :  { %v729_v39 = vadd.f32 %v728_v0, %v663_v58  ;;  %vm582_vm14 = vcmp.ne.f32.partialorder %v1176_v26, 0.0 }
 0x116   :  { %v550_v63 = vsel %vm549_vm4, %v1142_v17, %v548_v47 }
 0x117   :  { %v553_v27 = vsel %vm551_vm5, %v552_v14, %v550_v63  ;;  %v730_v55 = vadd.f32 %v729_v39, %v664_v10 }
 0x118   :  { %v597_v45 = vsub.f32 0.1, %v553_v27 }
 0x119   :  { %v731_v17 = vadd.f32 %v730_v55, %v665_v29 }
 0x11a   :  { %v840_v1 = vpop.eup %839  ;;  %v613_v43 = vmax.f32 %v597_v45, 0.0 }
 0x11b   :  { %v562_v24 = vmul.f32 %v840_v1, %v1167_v32 }
 0x11c   :  { %v629_v44 = vsel %vm581_vm12, %v613_v43, 0.0 }
 0x11d   :  { %v842_v5 = vpop.eup %841  ;;  %v564_v7 = vsel %vm563_vm8, %v1167_v32, %v562_v24  ;;  %v666_v18 = vmul.f32 %v1030_v12, %v629_v44 }
 0x11e   :  { %v555_v33 = vmul.f32 %v842_v5, %v1176_v26  ;;  %v567_v42 = vsel %vm565_vm9, %v566_v8, %v564_v7 }
 0x11f   :  { %v599_v11 = vsub.f32 0.1, %v567_v42  ;;  %v732_v50 = vadd.f32 %v731_v17, %v666_v18 }
 0x120   :  { %v557_v6 = vsel %vm556_vm11, %v1176_v26, %v555_v33 }
 0x121   :  { %v560_v13 = vsel %vm558_vm13, %v559_v35, %v557_v6  ;;  %v615_v16 = vmax.f32 %v599_v11, 0.0 }
 0x122   :  { %v598_v15 = vsub.f32 0.1, %v560_v13 }
 0x123   :  { %v631_v21 = vsel %vm583_vm15, %v615_v16, 0.0 }
 0x124   :  { %v614_v19 = vmax.f32 %v598_v15, 0.0  ;;  %v668_v46 = vmul.f32 %v1030_v12, %v631_v21 }
 0x126   :  { %v630_v20 = vsel %vm582_vm14, %v614_v19, 0.0 }
 0x127   :  { %v667_v52 = vmul.f32 %v1030_v12, %v630_v20 }
 0x129   :  { %v733_v37 = vadd.f32 %v732_v50, %v667_v52 }
 0x12b   :  { %v734_v57 = vadd.f32 %v733_v37, %v668_v46 }
 0x12d   :  { %735 = vadd.xlane.f32.xlu1 %v734_v57 }
 0x1ba   :  { %v736_v23 = vpop.xlane.xlu1 %735 }
 0x1bb   :  { %v737_v30 = vrot.slane %v736_v23, 4 }
 0x1bd   :  { %v738_v31 = vadd.f32 %v737_v30, %v736_v23 }
 0x1bf   :  { %v739_v34 = vrot.slane %v738_v31, 2 }
 0x1c1   :  { %v740_v36 = vadd.f32 %v739_v34, %v738_v31 }
 0x1c3   :  { %v741_v38 = vrot.slane %v740_v36, 1 }
 0x1c5   :  { %v742_v26 = vadd.f32 %v741_v38, %v740_v36 }
 0x1c7   :  { %775 = vpush %v742_v26 }
 0x1f8   :  { %s776_s0 = spop %775 }
 0x1f9   :  { %s744_s1 = smul.f32 0.00024414063, %s776_s0 }
 0x1fb   :  { %746 = sst [smem:[#allocation6]] %s744_s1 }
 0x1fc   :  { %852 = shalt.err (!%p849_p5)
}
 0x1fd   :  { %s858_s15 = smov [#allocation6]  }
 0x1fe   :  { %754 = dma.smem_to_hbm %s858_s15, 16, %s1234_s4, [#allocation7]  }
 0x1ff   :  { %853 = dma.done.wait [#allocation7], 16  }
 0x200   :  { %854 = vsyncadd [#allocation7], 4294967280 }
 0x201   :  { %758 = sfence }
 0x202   :  { %759 = vsyncpa [#allocation7], 1 }

</bundles_post_ra>
